<compile_context>
chip_gen: v7x
topology: tpu7x:2x2x1
jax: 0.10.0
libtpu: 0.0.40
codegen_flags: <defaults>
</compile_context>

<pallas_src>
import jax
import jax.numpy as jnp
from jax.experimental import pallas as pl
from jax.experimental.pallas import tpu as pltpu


def _round_up(x, m):
    return (x + m - 1) // m * m


def _pad2d(a, shape):
    """Zero-pad a 2-D array up to `shape` (no-op / no copy if already that shape)."""
    if a.shape == shape:
        return a
    return jnp.zeros(shape, a.dtype).at[: a.shape[0], : a.shape[1]].set(a)


def _linear_l2norm_kernel(x_ref, w_ref, b_ref, o_ref, acc_ref):
    # Accumulate x @ W^T over K tiles (W passed pre-transposed + zero-padded:
    # [D_in_p, D_out_p]); the output block is resident across the K axis.
    k = pl.program_id(1)

    @pl.when(k == 0)
    def _():
        acc_ref[...] = jnp.zeros_like(acc_ref)

    acc_ref[...] += jnp.dot(
        x_ref[...], w_ref[...], preferred_element_type=jnp.float32
    )

    @pl.when(k == pl.num_programs(1) - 1)
    def _():
        out = acc_ref[...] + b_ref[...]
        # F.normalize(out, dim=1, p=2, eps=1e-12):
        #   row / max(||row||, 1e-12) == row * rsqrt(max(sum(row^2), 1e-24)).
        # Padded columns are exactly 0, so the row sum is unaffected.
        sq = jnp.sum(out * out, axis=1, keepdims=True)
        inv = jax.lax.rsqrt(jnp.maximum(sq, jnp.float32(1e-24)))
        o_ref[...] = (out * inv).astype(o_ref.dtype)


def my_model_forward(x, w1, b1, *, block_b=256, block_k=512):
    """x: [B, D_in], w1: [D_out, D_in] (PyTorch layout), b1: [D_out] -> [B, D_out]."""
    B, D_in = x.shape
    D_out = w1.shape[0]

    # Lane-dense padding (128 lanes) + sublane padding (8) for the batch tile.
    D_in_p = _round_up(D_in, 128)
    D_out_p = _round_up(D_out, 128)
    tm = block_b if B >= block_b else _round_up(B, 8)
    B_p = _round_up(B, tm)
    tk = min(D_in_p, _round_up(block_k, 128))
    K_p = _round_up(D_in_p, tk)

    # Zero-padded operands: padded K rows / N columns contribute exactly 0,
    # so both the matmul and the row norm are unaffected.
    x_p = _pad2d(x.astype(jnp.float32), (B_p, K_p))
    w_t = _pad2d(w1.T.astype(jnp.float32), (K_p, D_out_p))
    b_p = _pad2d(b1.astype(jnp.float32).reshape(1, D_out), (1, D_out_p))

    out = pl.pallas_call(
        _linear_l2norm_kernel,
        out_shape=jax.ShapeDtypeStruct((B_p, D_out_p), jnp.float32),
        grid=(B_p // tm, K_p // tk),
        in_specs=[
            pl.BlockSpec((tm, tk), lambda i, k: (i, k)),
            pl.BlockSpec((tk, D_out_p), lambda i, k: (k, 0)),
            pl.BlockSpec((1, D_out_p), lambda i, k: (0, 0)),
        ],
        out_specs=pl.BlockSpec((tm, D_out_p), lambda i, k: (i, 0)),
        scratch_shapes=[pltpu.VMEM((tm, D_out_p), jnp.float32)],
        compiler_params=pltpu.CompilerParams(
            dimension_semantics=("parallel", "arbitrary")
        ),
    )(x_p, w_t, b_p)

    if (B_p, D_out_p) == (B, D_out):
        return out
    return out[:B, :D_out]


if __name__ == "__main__":
    # dims = (D_in, D_out) as in my_model(dims); small demo shapes.
    D_in, D_out = 32, 16
    B = 8

    key = jax.random.PRNGKey(0)
    kx, kw1, kb1 = jax.random.split(key, 3)

    # Deterministic parameter init (synthetic; mimics nn.Linear uniform init scale).
    bound = 1.0 / jnp.sqrt(jnp.float32(D_in))
    w1 = jax.random.uniform(kw1, (D_out, D_in), jnp.float32, -bound, bound)  # PyTorch layout
    b1 = jax.random.uniform(kb1, (D_out,), jnp.float32, -bound, bound)
    # TODO(synk): layers2 / mu / gaussian-noise branch (out2) is computed but
    # never returned by forward, so it is intentionally omitted from the kernel.

    x = jax.random.normal(kx, (B, D_in), jnp.float32)

    out = my_model_forward(x, w1, b1)
    jax.block_until_ready(out)

    # Reference check in plain JAX (matches F.normalize(..., dim=1, p=2, eps=1e-12)).
    ref = x @ w1.T + b1
    ref = ref / jnp.maximum(jnp.linalg.norm(ref, axis=1, keepdims=True), 1e-12)
    assert out.shape == (B, D_out)
    assert jnp.allclose(out, ref, atol=1e-5, rtol=1e-5)

    print("KERNEL_OK")
</pallas_src>

<mosaic_0001>
module attributes {stable_mosaic.version = 11 : i64} {
  func.func @_linear_l2norm_kernel(%arg0: i32, %arg1: i32, %arg2: memref<8x128xf32, #tpu.memory_space<vmem>>, %arg3: memref<128x128xf32, #tpu.memory_space<vmem>>, %arg4: memref<1x128xf32, #tpu.memory_space<vmem>>, %arg5: memref<8x128xf32, #tpu.memory_space<vmem>>, %arg6: memref<8x128xf32, #tpu.memory_space<vmem>>) attributes {dimension_semantics = [#tpu.dimension_semantics<parallel>, #tpu.dimension_semantics<arbitrary>], iteration_bounds = array<i64: 1, 1>, scalar_prefetch = 0 : i64, scratch_operands = 1 : i64, tpu.core_type = #tpu.core_type<tc>, window_params = [{transform_indices = @transform_0, window_bounds = array<i64: 8, 128>}, {transform_indices = @transform_1, window_bounds = array<i64: 128, 128>}, {pipeline_mode = #tpu.pipeline_mode<synchronous>, transform_indices = @transform_2, window_bounds = array<i64: 1, 128>}, {transform_indices = @transform_3, window_bounds = array<i64: 8, 128>}]} {
    %c0_i32 = arith.constant 0 : i32
    %0 = arith.cmpi eq, %arg1, %c0_i32 : i32
    %1 = arith.extui %0 : i1 to i32
    %c0_i32_0 = arith.constant 0 : i32
    %2 = arith.cmpi ne, %1, %c0_i32_0 : i32
    scf.if %2 {
      %cst_10 = arith.constant 0.000000e+00 : f32
      %12 = vector.broadcast %cst_10 : f32 to vector<8x128xf32>
      %c0_11 = arith.constant 0 : index
      %c0_12 = arith.constant 0 : index
      %13 = vector.load %arg6[%c0_11, %c0_12] : memref<8x128xf32, #tpu.memory_space<vmem>>, vector<8x128xf32>
      tpu.vector_store %arg6[%c0_11, %c0_12], %12 {strides = array<i32>} : memref<8x128xf32, #tpu.memory_space<vmem>>, vector<8x128xf32>,
    } else {
    }
    %c0 = arith.constant 0 : index
    %c0_1 = arith.constant 0 : index
    %3 = vector.load %arg6[%c0, %c0_1] : memref<8x128xf32, #tpu.memory_space<vmem>>, vector<8x128xf32>
    %c0_2 = arith.constant 0 : index
    %c0_3 = arith.constant 0 : index
    %4 = vector.load %arg2[%c0_2, %c0_3] : memref<8x128xf32, #tpu.memory_space<vmem>>, vector<8x128xf32>
    %c0_4 = arith.constant 0 : index
    %c0_5 = arith.constant 0 : index
    %5 = vector.load %arg3[%c0_4, %c0_5] : memref<128x128xf32, #tpu.memory_space<vmem>>, vector<128x128xf32>
    %cst = arith.constant dense<0.000000e+00> : vector<8x128xf32>
    %6 = tpu.matmul %4, %5, %cst {dimension_numbers = #tpu.dot_dimension_numbers<[1], [0], [0], [1], [0, 0, 1, 1], [], []>} : vector<8x128xf32>, vector<128x128xf32>, vector<8x128xf32> -> vector<8x128xf32>
    %7 = arith.addf %3, %6 : vector<8x128xf32>
    %c0_6 = arith.constant 0 : index
    %c0_7 = arith.constant 0 : index
    %8 = vector.load %arg6[%c0_6, %c0_7] : memref<8x128xf32, #tpu.memory_space<vmem>>, vector<8x128xf32>
    tpu.vector_store %arg6[%c0_6, %c0_7], %7 {strides = array<i32>} : memref<8x128xf32, #tpu.memory_space<vmem>>, vector<8x128xf32>,
    %c0_i32_8 = arith.constant 0 : i32
    %9 = arith.cmpi eq, %arg1, %c0_i32_8 : i32
    %10 = arith.extui %9 : i1 to i32
    %c0_i32_9 = arith.constant 0 : i32
    %11 = arith.cmpi ne, %10, %c0_i32_9 : i32
    scf.if %11 {
      %c0_10 = arith.constant 0 : index
      %c0_11 = arith.constant 0 : index
      %12 = vector.load %arg6[%c0_10, %c0_11] : memref<8x128xf32, #tpu.memory_space<vmem>>, vector<8x128xf32>
      %c0_12 = arith.constant 0 : index
      %c0_13 = arith.constant 0 : index
      %13 = vector.load %arg4[%c0_12, %c0_13] : memref<1x128xf32, #tpu.memory_space<vmem>>, vector<1x128xf32>
      %14 = vector.broadcast %13 : vector<1x128xf32> to vector<8x128xf32>
      %15 = arith.addf %12, %14 : vector<8x128xf32>
      %16 = arith.mulf %15, %15 : vector<8x128xf32>
      %cst_14 = arith.constant dense<0.000000e+00> : vector<8xf32>
      %17 = vector.multi_reduction <add>, %16, %cst_14 [1] : vector<8x128xf32> to vector<8xf32>
      %18 = vector.shape_cast %17 : vector<8xf32> to vector<8x1xf32>
      %cst_15 = arith.constant 1.000000e-24 : f32
      %19 = vector.broadcast %cst_15 : f32 to vector<8x1xf32>
      %20 = arith.maximumf %18, %19 : vector<8x1xf32>
      %21 = math.rsqrt %20 : vector<8x1xf32>
      %22 = vector.broadcast %21 : vector<8x1xf32> to vector<8x128xf32>
      %23 = arith.mulf %15, %22 : vector<8x128xf32>
      %c0_16 = arith.constant 0 : index
      %c0_17 = arith.constant 0 : index
      %24 = vector.load %arg5[%c0_16, %c0_17] : memref<8x128xf32, #tpu.memory_space<vmem>>, vector<8x128xf32>
      tpu.vector_store %arg5[%c0_16, %c0_17], %23 {strides = array<i32>} : memref<8x128xf32, #tpu.memory_space<vmem>>, vector<8x128xf32>,
    } else {
    }
    return
  }
  func.func @transform_0(%arg0: i32, %arg1: i32) -> (i32, i32) {
    %c0_i32 = arith.constant 0 : i32
    return %arg0, %arg1 : i32, i32
  }
  func.func @transform_1(%arg0: i32, %arg1: i32) -> (i32, i32) {
    %c0_i32 = arith.constant 0 : i32
    %c0_i32_0 = arith.constant 0 : i32
    return %arg1, %c0_i32 : i32, i32
  }
  func.func @transform_2(%arg0: i32, %arg1: i32) -> (i32, i32) {
    %c0_i32 = arith.constant 0 : i32
    %c0_i32_0 = arith.constant 0 : i32
    %c0_i32_1 = arith.constant 0 : i32
    return %c0_i32, %c0_i32_0 : i32, i32
  }
  func.func @transform_3(%arg0: i32, %arg1: i32) -> (i32, i32) {
    %c0_i32 = arith.constant 0 : i32
    %c0_i32_0 = arith.constant 0 : i32
    return %arg0, %c0_i32 : i32, i32
  }
}

</mosaic_0001>

<bundles_post_ra>
// kernel: tpu_custom_call.1
= control target key start
LH: loop header
LB: loop body
LE: loop exit
PB: predicated region body
PF: predicated region fallthrough
CT: control target
= control target key end

     0   :  { %8 = vsyncpa [#allocation4], 0  ;;  %s404_s0 = inlined_call_operand.hbm [shape: f32[8,128], index: 0, kind: input, shape index: {}]   ;;  %s405_s1 = inlined_call_operand.hbm [shape: f32[128,128], index: 1, kind: input, shape index: {}]   ;;  %s406_s2 = inlined_call_operand.vmem [shape: f32[1,128], index: 2, kind: input, shape index: {}]   ;;  %s407_s3 = inlined_call_operand.hbm [shape: f32[8,128], index: 3, kind: output, shape index: {}]  }
   0x1   :  { %9 = vsyncpa [#allocation7], 0 }
   0x2   :  { %10 = vsyncpa [#allocation5], 0  ;;  %s330_s12 = smov [#allocation3]   ;;  %s331_s14 = smov [#allocation6]  }
   0x3   :  { %s17_s13 = sshll.u32 %s330_s12, 4  ;;  %s26_s15 = sshll.u32 %s331_s14, 4  ;;  %s18_s13 = int_to_ptr.vmem [resolvable:$true] %s17_s13  ;;  %s358_s15 = int_to_ptr.vmem [resolvable:$true] %s26_s15 }
   0x4   :  { %s258_s18 = scalar_lea.hbm %s404_s0, 128 }
   0x5   :  { %p259_p0 = scmp.ne.s32.totalorder %s404_s0, %s258_s18  ;;  %p262_p1 = scmp.lt.u32.totalorder %s258_s18, %s404_s0 }
   0x7   :  { %p264_p2 = pnand %p262_p1, %p259_p0 }
   0x9   :  { %267 = shalt.err (!%p264_p2)
}
   0xa   :  { %s268_s23 = scalar_lea.vmem %s18_s13, 128  ;;  %p273_p4 = scmp.lt.s32.totalorder %s18_s13, %s18_s13 }
   0xb   :  { %p269_p3 = scmp.ne.s32.totalorder %s18_s13, %s268_s23  ;;  %p274_p5 = scmp.lt.s32.totalorder %s268_s23, %s268_s23 }
   0xd   :  { %p275_p6 = por %p274_p5, %p273_p4 }
   0xf   :  { %p276_p7 = pnand %p275_p6, %p269_p3 }
  0x11   :  { %279 = shalt.err (!%p276_p7)
}
  0x12   :  { %20 = dma.hbm_to_vmem [thread:$0]  %s404_s0, 128, %s18_s13, [#allocation4]  }
  0x13   :  { %s280_s28 = scalar_lea.hbm %s405_s1, 2048 }
  0x14   :  { %p281_p8 = scmp.ne.s32.totalorder %s405_s1, %s280_s28  ;;  %p284_p9 = scmp.lt.u32.totalorder %s280_s28, %s405_s1 }
  0x16   :  { %p286_p10 = pnand %p284_p9, %p281_p8 }
  0x18   :  { %289 = shalt.err (!%p286_p10)
}
  0x19   :  { %s290_s6 = scalar_lea.vmem %s358_s15, 2048  ;;  %p295_p12 = scmp.lt.s32.totalorder %s358_s15, %s358_s15 }
  0x1a   :  { %p291_p11 = scmp.ne.s32.totalorder %s358_s15, %s290_s6  ;;  %p296_p13 = scmp.lt.s32.totalorder %s290_s6, %s290_s6 }
  0x1c   :  { %p297_p0 = por %p296_p13, %p295_p12 }
  0x1e   :  { %p298_p1 = pnand %p297_p0, %p291_p11 }
  0x20   :  { %301 = shalt.err (!%p298_p1)
}
  0x21   :  { %s332_s0 = smov 128   ;;  %s333_s7 = smov 8  }
  0x22   :  { %32 = dma.hbm_to_vmem [thread:$0]  %s405_s1, 2048, %s358_s15, [#allocation7], %s332_s0, %s332_s0, %s333_s7  }
  0x23   :  { %324 = dma.done.wait [#allocation4], 128  }
  0x24   :  { %325 = vsyncadd [#allocation4], 4294967168 }
  0x25   :  { %326 = dma.done.wait [#allocation7], 2048  }
  0x26   :  { %327 = vsyncadd [#allocation7], 4294965248  ;;  %v334_v0 = vmov 0.0|0.0   ;;  %vm335_vm0 = vmmov 0   ;;  %v336_v1 = vmov 0.0   ;;  %v48_v2 = vld [vmem:[#allocation6] sm:$0xff] }
  0x27   :  { %224 = vmatprep.subr.bf16.mxu0 %v334_v0  ;;  %221 = vmatprep.mubr.msk.f32.mxu0 %vm335_vm0, %v336_v1  ;;  %v49_v3 = vld [vmem:[#allocation6 + $0x8] sm:$0xff]  ;;  %v50_v4 = vld [vmem:[#allocation6 + $0x10] sm:$0xff]  ;;  %v51_v6 = vld [vmem:[#allocation6 + $0x18] sm:$0xff]  ;;  %s337_s11 = smov [#allocation8]  }
  0x28   :  { %v225_v5 = vpack.c.bf16 %v49_v3, %v48_v2  ;;  %v228_v7 = vpack.c.bf16 %v51_v6, %v50_v4  ;;  %v52_v8 = vld [vmem:[#allocation6 + $0x20] sm:$0xff]  ;;  %v53_v9 = vld [vmem:[#allocation6 + $0x28] sm:$0xff]  ;;  %v54_v11 = vld [vmem:[#allocation6 + $0x30] sm:$0xff]  ;;  %s161_s12 = sshll.u32 %s337_s11, 4  ;;  %s162_s12 = int_to_ptr.vmem [resolvable:$true] %s161_s12 }
  0x29   :  { %v231_v10 = vpack.c.bf16 %v53_v9, %v52_v8  ;;  %v55_v12 = vld [vmem:[#allocation6 + $0x38] sm:$0xff]  ;;  %v56_v14 = vld [vmem:[#allocation6 + $0x40] sm:$0xff]  ;;  %v57_v15 = vld [vmem:[#allocation6 + $0x48] sm:$0xff]  ;;  %s302_s13 = scalar_lea.vmem %s162_s12, 128  ;;  %p307_p3 = scmp.lt.s32.totalorder %s162_s12, %s162_s12 }
  0x2a   :  { %226 = vmatpush3.bf16.msra.mxu0 %v225_v5  ;;  %v234_v13 = vpack.c.bf16 %v55_v12, %v54_v11  ;;  %v237_v16 = vpack.c.bf16 %v57_v15, %v56_v14  ;;  %v58_v17 = vld [vmem:[#allocation6 + $0x50] sm:$0xff]  ;;  %v59_v18 = vld [vmem:[#allocation6 + $0x58] sm:$0xff]  ;;  %v60_v20 = vld [vmem:[#allocation6 + $0x60] sm:$0xff]  ;;  %p303_p2 = scmp.ne.s32.totalorder %s162_s12, %s302_s13  ;;  %p308_p4 = scmp.lt.s32.totalorder %s302_s13, %s302_s13 }
  0x2b   :  { %227 = vmatprep.subr.bf16.mxu0 %v334_v0  ;;  %v240_v19 = vpack.c.bf16 %v59_v18, %v58_v17  ;;  %v61_v21 = vld [vmem:[#allocation6 + $0x68] sm:$0xff]  ;;  %v62_v23 = vld [vmem:[#allocation6 + $0x70] sm:$0xff]  ;;  %v63_v24 = vld [vmem:[#allocation6 + $0x78] sm:$0xff] }
  0x2c   :  { %v243_v22 = vpack.c.bf16 %v61_v21, %v60_v20  ;;  %v246_v25 = vpack.c.bf16 %v63_v24, %v62_v23  ;;  %v47_v26 = vld [vmem:[#allocation3] sm:$0xff]  ;;  %p309_p5 = por %p308_p4, %p307_p3 }
  0x2d   :  { %v171_v27 = vld [vmem:[%s406_s2] ss:$0 sm:$0xff] }
  0x2e   :  { %229 = vmatpush3.bf16.msra.mxu0 %v228_v7  ;;  %p310_p6 = pnand %p309_p5, %p303_p2 }
  0x2f   :  { %230 = vmatprep.subr.bf16.mxu0 %v334_v0 }
  0x32   :  { %232 = vmatpush3.bf16.msra.mxu0 %v231_v10 }
  0x33   :  { %233 = vmatprep.subr.bf16.mxu0 %v334_v0 }
  0x36   :  { %235 = vmatpush3.bf16.msra.mxu0 %v234_v13 }
  0x37   :  { %236 = vmatprep.subr.bf16.mxu0 %v334_v0 }
  0x3a   :  { %238 = vmatpush3.bf16.msra.mxu0 %v237_v16 }
  0x3b   :  { %239 = vmatprep.subr.bf16.mxu0 %v334_v0 }
  0x3e   :  { %241 = vmatpush3.bf16.msra.mxu0 %v240_v19 }
  0x3f   :  { %242 = vmatprep.subr.bf16.mxu0 %v334_v0 }
  0x42   :  { %244 = vmatpush3.bf16.msra.mxu0 %v243_v22 }
  0x43   :  { %245 = vmatprep.subr.bf16.mxu0 %v334_v0 }
  0x46   :  { %247 = vmatpush3.bf16.msra.mxu0 %v246_v25 }
  0x49   :  { %222 = vmatmul.mubr.f32.vlgmr.msra.gmra.mrb[0].mxu0 %v47_v26 }
 0x11c   :  { %v130_v28 = vpop.f32.mrb[0].mxu0 }
 0x11d   :  { %v147_v29 = vadd.f32 %v171_v27, %v130_v28  ;;  %v223_v30 = vpop.f32.mrb[1].mxu0 }
 0x11f   :  { %v148_v31 = vmul.f32 %v147_v29, %v147_v29 }
 0x121   :  { %149 = vadd.xlane.f32.xlu0 %v148_v31 }
 0x1ae   :  { %v150_v32 = vpop.xlane.xlu0 %149 }
 0x1af   :  { %v151_v33 = vmax.f32 %v150_v32, 1e-24 }
 0x1b1   :  { %256 = vrsqrt.f32 %v151_v33 }
 0x1bb   :  { %v257_v34 = vpop.eup %256 }
 0x1bc   :  { %v153_v35 = vmul.f32 %v257_v34, %v147_v29 }
 0x1be   :  { %154 = vst [vmem:[#allocation8] sm:$0xff] %v153_v35 }
 0x1bf   :  { %313 = shalt.err (!%p310_p6)
}
 0x1c0   :  { %s314_s15 = scalar_lea.hbm %s407_s3, 128 }
 0x1c1   :  { %p315_p7 = scmp.ne.s32.totalorder %s407_s3, %s314_s15  ;;  %p318_p8 = scmp.lt.u32.totalorder %s314_s15, %s407_s3 }
 0x1c3   :  { %p320_p9 = pnand %p318_p8, %p315_p7 }
 0x1c5   :  { %323 = shalt.err (!%p320_p9)
}
 0x1c6   :  { %164 = dma.vmem_to_hbm [thread:$0]  %s162_s12, 128, %s407_s3, [#allocation5]  }
 0x1c7   :  { %328 = dma.done.wait [#allocation5], 128  }
 0x1c8   :  { %329 = vsyncadd [#allocation5], 4294967168 }
 0x1c9   :  { %168 = vsyncpa [#allocation4], 1 }
 0x1ca   :  { %169 = vsyncpa [#allocation7], 1 }
 0x1cb   :  { %170 = vsyncpa [#allocation5], 1 }

</bundles_post_ra>
